<compile_context>
chip_gen: v6e
topology: v6e:2x2x1
jax: 0.10.0
libtpu: 0.0.40
codegen_flags: <defaults>
</compile_context>

<pallas_src>
import functools

import jax
import jax.numpy as jnp
from jax import lax
from jax.experimental import pallas as pl
from jax.experimental.pallas import tpu as pltpu


LANE = 128
MAX_TILE_B = 2048  # review: 1-2K rows keeps per-step overhead < ~10% of step time


def _round_up(n, m):
    return (n + m - 1) // m * m


def _cdiv(a, b):
    return -(-a // b)


def _choose_tile_b(B, tile_b=None):
    """Pick the batch tile: big tiles to amortize per-step overhead, but at
    least 2 (even) grid steps when B >= 16 so both v7x TensorCores are used."""
    if tile_b is not None:
        return _round_up(tile_b, 8)
    if B <= 8:
        return 8
    n_steps = max(2 if B >= 16 else 1, _cdiv(B, MAX_TILE_B))
    if B >= 16 and n_steps % 2:
        n_steps += 1  # even 'parallel' step count splits evenly across 2 TCs
    return _round_up(_cdiv(B, n_steps), 8)


# ----------------------------------------------------------------------------
# Kernel bodies
# ----------------------------------------------------------------------------
def _dqn_mlp(x_ref, w1_ref, b1_ref, w2_ref, b2_ref, w3_ref, b3_ref):
    """Shared fused MLP body. Returns lane-padded f32 Q of shape (tile_b, 128);
    padded action columns are exactly 0 (w3/b3 padded with zeros)."""
    # ----- Layer 1: Linear(4, 128) + ReLU on the VPU. -----
    # K=4 would occupy only 4 systolic rows of the MXU; 4 broadcast-FMAs on the
    # VPU avoid a nearly-empty vmatmul push/pop on the latency-critical path.
    x = x_ref[...]                         # (tile_b, 4)  f32
    w1 = w1_ref[...]                       # (4, 128)     f32
    h1 = x[:, 0:1] * w1[0:1, :]
    for k in range(1, x.shape[1]):         # static unroll (in_dim == 4)
        h1 = h1 + x[:, k:k + 1] * w1[k:k + 1, :]
    h1 = jnp.maximum(h1 + b1_ref[...], 0.0)

    # ----- Layer 2: Linear(128, 128) + ReLU (bf16 MXU, f32 accumulate). -----
    h2 = jnp.dot(h1.astype(jnp.bfloat16), w2_ref[...],
                 preferred_element_type=jnp.float32)
    h2 = jnp.maximum(h2 + b2_ref[...], 0.0)

    # ----- Layer 3: Linear(128, A_pad), head padded to 128 lanes. -----
    q = jnp.dot(h2.astype(jnp.bfloat16), w3_ref[...],
                preferred_element_type=jnp.float32)
    return q + b3_ref[...]


def dqn_q_kernel(x_ref, w1_ref, b1_ref, w2_ref, b2_ref, w3_ref, b3_ref, o_ref):
    """Writes the full lane-padded Q slab (training / eval path)."""
    q = _dqn_mlp(x_ref, w1_ref, b1_ref, w2_ref, b2_ref, w3_ref, b3_ref)
    o_ref[...] = q.astype(o_ref.dtype)


def dqn_act_kernel(num_actions, x_ref, w1_ref, b1_ref, w2_ref, b2_ref,
                   w3_ref, b3_ref, a_ref):
    """Acting path: fused greedy argmax over real actions; writes int32
    actions only (4 B/row instead of a 512 B/row padded Q write)."""
    q = _dqn_mlp(x_ref, w1_ref, b1_ref, w2_ref, b2_ref, w3_ref, b3_ref)
    col = lax.broadcasted_iota(jnp.int32, q.shape, 1)
    # Mask padded columns to -inf so a zero-valued padded action can never win
    # when all real Q-values are negative (review correctness concern).
    q = jnp.where(col < num_actions, q, -jnp.inf)
    m = jnp.max(q, axis=-1, keepdims=True)
    # First index achieving the max (matches torch.argmax tie-breaking).
    idx = jnp.where(q == m, col, q.shape[-1])
    a_ref[...] = jnp.min(idx, axis=-1, keepdims=True).astype(jnp.int32)


# ----------------------------------------------------------------------------
# pallas_call wrappers
# ----------------------------------------------------------------------------
def _mlp_pallas_call(kernel_fn, x_padded, params, out_cols, out_dtype, tile_b):
    w1, b1 = params["w1"], params["b1"]
    w2, b2 = params["w2"], params["b2"]
    w3, b3 = params["w3"], params["b3"]
    B_pad = x_padded.shape[0]
    grid = (B_pad // tile_b,)

    cp_kwargs = dict(dimension_semantics=("parallel",))
    if tile_b > 2048:
        # Only needed for user-overridden very large tiles (v5e default scoped
        # VMEM is 16 MiB); generous per-row estimate for x/out double-buffers
        # plus f32/bf16 intermediates, capped at v7x physical VMEM.
        cp_kwargs["vmem_limit_bytes"] = min(64 << 20,
                                            tile_b * (6 << 10) + (4 << 20))

    # TODO(synk): for single-observation acting loops, keep weights resident
    # across calls (cross-call VMEM/semaphore futures, P10) instead of
    # re-DMAing ~70 KB of weights per call.
    return pl.pallas_call(
        kernel_fn,
        out_shape=jax.ShapeDtypeStruct((B_pad, out_cols), out_dtype),
        grid_spec=pltpu.PrefetchScalarGridSpec(
            num_scalar_prefetch=0,
            grid=grid,
            in_specs=[
                # batch-tiled activations
                pl.BlockSpec((tile_b, x_padded.shape[1]), lambda i: (i, 0)),
                # full (untiled) weight / bias blocks, resident across the grid
                pl.BlockSpec(w1.shape, lambda i: (0, 0)),
                pl.BlockSpec(b1.shape, lambda i: (0, 0)),
                pl.BlockSpec(w2.shape, lambda i: (0, 0)),
                pl.BlockSpec(b2.shape, lambda i: (0, 0)),
                pl.BlockSpec(w3.shape, lambda i: (0, 0)),
                pl.BlockSpec(b3.shape, lambda i: (0, 0)),
            ],
            out_specs=pl.BlockSpec((tile_b, out_cols), lambda i: (i, 0)),
        ),
        compiler_params=pltpu.CompilerParams(**cp_kwargs),
    )(x_padded, w1, b1, w2, b2, w3, b3)


def _pad_batch(x, tile_b):
    B = x.shape[0]
    B_pad = _round_up(B, tile_b)
    if B_pad != B:
        x = jnp.pad(x, ((0, B_pad - B), (0, 0)))
    return x


def dqn_forward_padded(x, params, *, tile_b=None, out_dtype=jnp.float32):
    """x: (B, 4) f32 -> lane-padded Q slab (B_pad, 128).

    Preferred entry point for fused downstream consumers: padded batch rows
    (>= B) are garbage and padded action columns (>= num_actions) are 0.0 —
    mask / slice them at the point of use inside the same jit.
    out_dtype=jnp.bfloat16 halves the HBM write traffic if acceptable."""
    B = x.shape[0]
    A_pad = params["w3"].shape[1]
    tile_b = _choose_tile_b(B, tile_b)
    x = _pad_batch(x, tile_b)
    return _mlp_pallas_call(dqn_q_kernel, x, params, A_pad, out_dtype, tile_b)


def dqn_forward(x, params, *, tile_b=None):
    """x: (B, 4) f32 -> (B, num_actions) f32 Q-values (PyTorch forward parity).

    Call this inside your own jax.jit so the trailing slice is placed lazily at
    the point of use rather than as a standalone HBM re-pack."""
    q = dqn_forward_padded(x, params, tile_b=tile_b)
    return q[: x.shape[0], : params["num_actions"]]


def dqn_act(x, params, *, tile_b=None):
    """x: (B, 4) f32 -> (B,) int32 greedy actions, argmax fused in-kernel."""
    B = x.shape[0]
    A = params["num_actions"]
    tile_b = _choose_tile_b(B, tile_b)
    x = _pad_batch(x, tile_b)
    kern = functools.partial(dqn_act_kernel, A)
    a = _mlp_pallas_call(kern, x, params, 1, jnp.int32, tile_b)
    return a[:B, 0]


# TODO(synk): fused gather of Q(s, a_taken) for the TD-loss path (<= 8 B/row
# output) — same structure as dqn_act_kernel with a prefetched action index.


# ----------------------------------------------------------------------------
# Init (matches the module's init_weights: kaiming_uniform relu, zero bias)
# ----------------------------------------------------------------------------
def kaiming_uniform(key, fan_in, shape):
    # PyTorch kaiming_uniform_(nonlinearity='relu'): bound = sqrt(2)*sqrt(3/fan_in)
    bound = jnp.sqrt(6.0 / fan_in)
    return jax.random.uniform(key, shape, jnp.float32, minval=-bound, maxval=bound)


def init_dqn_params(key, in_dim=4, hidden=128, num_actions=2):
    k1, k2, k3 = jax.random.split(key, 3)
    a_pad = _round_up(max(num_actions, 1), LANE)
    w3 = kaiming_uniform(k3, hidden, (hidden, num_actions))
    w3 = jnp.pad(w3, ((0, 0), (0, a_pad - num_actions)))  # lane-pad the Q head
    params = {
        # Stored (in, out) — transpose of PyTorch's (out, in). fan_in = layer in_dim.
        "w1": kaiming_uniform(k1, in_dim, (in_dim, hidden)),              # f32 (VPU path)
        "b1": jnp.zeros((1, hidden), jnp.float32),
        "w2": kaiming_uniform(k2, hidden, (hidden, hidden)).astype(jnp.bfloat16),
        "b2": jnp.zeros((1, hidden), jnp.float32),
        "w3": w3.astype(jnp.bfloat16),                                    # (hidden, 128)
        "b3": jnp.zeros((1, a_pad), jnp.float32),
        "num_actions": num_actions,
    }
    return params


def dqn_forward_ref(x, p):
    # Mirrors the kernel's arithmetic (bf16 weights for layers 2/3, f32
    # accumulation) so the comparison can be tight.
    hp = jax.lax.Precision.HIGHEST
    A = p["num_actions"]
    h1 = jnp.maximum(jnp.dot(x, p["w1"], precision=hp) + p["b1"], 0.0)
    h2 = jnp.dot(h1.astype(jnp.bfloat16).astype(jnp.float32),
                 p["w2"].astype(jnp.float32), precision=hp) + p["b2"]
    h2 = jnp.maximum(h2, 0.0)
    q = jnp.dot(h2.astype(jnp.bfloat16).astype(jnp.float32),
                p["w3"].astype(jnp.float32), precision=hp) + p["b3"]
    return q[:, :A]


if __name__ == "__main__":
    key = jax.random.PRNGKey(0)
    k_param, k_x = jax.random.split(key)

    batch = 8
    num_actions = 2
    params = init_dqn_params(k_param, in_dim=4, hidden=128, num_actions=num_actions)
    x = jax.random.normal(k_x, (batch, 4), jnp.float32)  # CartPole observation batch

    # Whole forward (kernel + lazy slice) under one jit, as recommended.
    fwd = jax.jit(lambda xx: dqn_forward(xx, params))
    q = jax.block_until_ready(fwd(x))

    # Whole act step (kernel with fused argmax) under one jit.
    act = jax.jit(lambda xx: dqn_act(xx, params))
    a = jax.block_until_ready(act(x))

    ref = dqn_forward_ref(x, params)
    assert q.shape == (batch, num_actions)
    assert jnp.allclose(q, ref, atol=1e-3, rtol=1e-3), "Q mismatch vs JAX reference"
    assert a.shape == (batch,)
    # The act kernel shares the exact MLP arithmetic of the Q kernel, so its
    # fused argmax must match the argmax of the kernel's own Q output.
    assert jnp.array_equal(a, jnp.argmax(q, axis=1).astype(jnp.int32)), \
        "fused argmax mismatch"

    # TODO(synk): ALE/Pong-v5 conv branch, NoisyLinear noise injection, and the
    # distributional softmax head are not exercised by the default constructor
    # arguments and are omitted from this kernel.
    print("KERNEL_OK")
</pallas_src>

<mosaic_0001>
module attributes {stable_mosaic.version = 11 : i64} {
  func.func @dqn_q_kernel(%arg0: i32, %arg1: memref<8x4xf32, #tpu.memory_space<vmem>>, %arg2: memref<4x128xf32, #tpu.memory_space<vmem>>, %arg3: memref<1x128xf32, #tpu.memory_space<vmem>>, %arg4: memref<128x128xbf16, #tpu.memory_space<vmem>>, %arg5: memref<1x128xf32, #tpu.memory_space<vmem>>, %arg6: memref<128x128xbf16, #tpu.memory_space<vmem>>, %arg7: memref<1x128xf32, #tpu.memory_space<vmem>>, %arg8: memref<8x128xf32, #tpu.memory_space<vmem>>) attributes {dimension_semantics = [#tpu.dimension_semantics<parallel>], iteration_bounds = array<i64: 1>, scalar_prefetch = 0 : i64, scratch_operands = 0 : i64, tpu.core_type = #tpu.core_type<tc>, window_params = [{transform_indices = @transform_0, window_bounds = array<i64: 8, 4>}, {pipeline_mode = #tpu.pipeline_mode<synchronous>, transform_indices = @transform_1, window_bounds = array<i64: 4, 128>}, {pipeline_mode = #tpu.pipeline_mode<synchronous>, transform_indices = @transform_2, window_bounds = array<i64: 1, 128>}, {pipeline_mode = #tpu.pipeline_mode<synchronous>, transform_indices = @transform_3, window_bounds = array<i64: 128, 128>}, {pipeline_mode = #tpu.pipeline_mode<synchronous>, transform_indices = @transform_4, window_bounds = array<i64: 1, 128>}, {pipeline_mode = #tpu.pipeline_mode<synchronous>, transform_indices = @transform_5, window_bounds = array<i64: 128, 128>}, {pipeline_mode = #tpu.pipeline_mode<synchronous>, transform_indices = @transform_6, window_bounds = array<i64: 1, 128>}, {transform_indices = @transform_7, window_bounds = array<i64: 8, 128>}]} {
    %c0 = arith.constant 0 : index
    %c0_0 = arith.constant 0 : index
    %0 = vector.load %arg1[%c0, %c0_0] : memref<8x4xf32, #tpu.memory_space<vmem>>, vector<8x4xf32>
    %c0_1 = arith.constant 0 : index
    %c0_2 = arith.constant 0 : index
    %1 = vector.load %arg2[%c0_1, %c0_2] : memref<4x128xf32, #tpu.memory_space<vmem>>, vector<4x128xf32>
    %2 = vector.extract_strided_slice %0 {offsets = [0, 0], sizes = [8, 1], strides = [1, 1]} : vector<8x4xf32> to vector<8x1xf32>
    %3 = vector.extract_strided_slice %1 {offsets = [0, 0], sizes = [1, 128], strides = [1, 1]} : vector<4x128xf32> to vector<1x128xf32>
    %4 = vector.broadcast %2 : vector<8x1xf32> to vector<8x128xf32>
    %5 = vector.broadcast %3 : vector<1x128xf32> to vector<8x128xf32>
    %6 = arith.mulf %4, %5 : vector<8x128xf32>
    %7 = vector.extract_strided_slice %0 {offsets = [0, 1], sizes = [8, 1], strides = [1, 1]} : vector<8x4xf32> to vector<8x1xf32>
    %8 = vector.extract_strided_slice %1 {offsets = [1, 0], sizes = [1, 128], strides = [1, 1]} : vector<4x128xf32> to vector<1x128xf32>
    %9 = vector.broadcast %7 : vector<8x1xf32> to vector<8x128xf32>
    %10 = vector.broadcast %8 : vector<1x128xf32> to vector<8x128xf32>
    %11 = arith.mulf %9, %10 : vector<8x128xf32>
    %12 = arith.addf %6, %11 : vector<8x128xf32>
    %13 = vector.extract_strided_slice %0 {offsets = [0, 2], sizes = [8, 1], strides = [1, 1]} : vector<8x4xf32> to vector<8x1xf32>
    %14 = vector.extract_strided_slice %1 {offsets = [2, 0], sizes = [1, 128], strides = [1, 1]} : vector<4x128xf32> to vector<1x128xf32>
    %15 = vector.broadcast %13 : vector<8x1xf32> to vector<8x128xf32>
    %16 = vector.broadcast %14 : vector<1x128xf32> to vector<8x128xf32>
    %17 = arith.mulf %15, %16 : vector<8x128xf32>
    %18 = arith.addf %12, %17 : vector<8x128xf32>
    %19 = vector.extract_strided_slice %0 {offsets = [0, 3], sizes = [8, 1], strides = [1, 1]} : vector<8x4xf32> to vector<8x1xf32>
    %20 = vector.extract_strided_slice %1 {offsets = [3, 0], sizes = [1, 128], strides = [1, 1]} : vector<4x128xf32> to vector<1x128xf32>
    %21 = vector.broadcast %19 : vector<8x1xf32> to vector<8x128xf32>
    %22 = vector.broadcast %20 : vector<1x128xf32> to vector<8x128xf32>
    %23 = arith.mulf %21, %22 : vector<8x128xf32>
    %24 = arith.addf %18, %23 : vector<8x128xf32>
    %c0_3 = arith.constant 0 : index
    %c0_4 = arith.constant 0 : index
    %25 = vector.load %arg3[%c0_3, %c0_4] : memref<1x128xf32, #tpu.memory_space<vmem>>, vector<1x128xf32>
    %26 = vector.broadcast %25 : vector<1x128xf32> to vector<8x128xf32>
    %27 = arith.addf %24, %26 : vector<8x128xf32>
    %cst = arith.constant 0.000000e+00 : f32
    %28 = vector.broadcast %cst : f32 to vector<8x128xf32>
    %29 = arith.maximumf %27, %28 : vector<8x128xf32>
    %30 = arith.truncf %29 : vector<8x128xf32> to vector<8x128xbf16>
    %c0_5 = arith.constant 0 : index
    %c0_6 = arith.constant 0 : index
    %31 = vector.load %arg4[%c0_5, %c0_6] : memref<128x128xbf16, #tpu.memory_space<vmem>>, vector<128x128xbf16>
    %cst_7 = arith.constant dense<0.000000e+00> : vector<8x128xf32>
    %32 = tpu.matmul %30, %31, %cst_7 {dimension_numbers = #tpu.dot_dimension_numbers<[1], [0], [0], [1], [0, 0, 1, 1], [], []>} : vector<8x128xbf16>, vector<128x128xbf16>, vector<8x128xf32> -> vector<8x128xf32>
    %c0_8 = arith.constant 0 : index
    %c0_9 = arith.constant 0 : index
    %33 = vector.load %arg5[%c0_8, %c0_9] : memref<1x128xf32, #tpu.memory_space<vmem>>, vector<1x128xf32>
    %34 = vector.broadcast %33 : vector<1x128xf32> to vector<8x128xf32>
    %35 = arith.addf %32, %34 : vector<8x128xf32>
    %cst_10 = arith.constant 0.000000e+00 : f32
    %36 = vector.broadcast %cst_10 : f32 to vector<8x128xf32>
    %37 = arith.maximumf %35, %36 : vector<8x128xf32>
    %38 = arith.truncf %37 : vector<8x128xf32> to vector<8x128xbf16>
    %c0_11 = arith.constant 0 : index
    %c0_12 = arith.constant 0 : index
    %39 = vector.load %arg6[%c0_11, %c0_12] : memref<128x128xbf16, #tpu.memory_space<vmem>>, vector<128x128xbf16>
    %cst_13 = arith.constant dense<0.000000e+00> : vector<8x128xf32>
    %40 = tpu.matmul %38, %39, %cst_13 {dimension_numbers = #tpu.dot_dimension_numbers<[1], [0], [0], [1], [0, 0, 1, 1], [], []>} : vector<8x128xbf16>, vector<128x128xbf16>, vector<8x128xf32> -> vector<8x128xf32>
    %c0_14 = arith.constant 0 : index
    %c0_15 = arith.constant 0 : index
    %41 = vector.load %arg7[%c0_14, %c0_15] : memref<1x128xf32, #tpu.memory_space<vmem>>, vector<1x128xf32>
    %42 = vector.broadcast %41 : vector<1x128xf32> to vector<8x128xf32>
    %43 = arith.addf %40, %42 : vector<8x128xf32>
    %c0_16 = arith.constant 0 : index
    %c0_17 = arith.constant 0 : index
    %44 = vector.load %arg8[%c0_16, %c0_17] : memref<8x128xf32, #tpu.memory_space<vmem>>, vector<8x128xf32>
    tpu.vector_store %arg8[%c0_16, %c0_17], %43 {strides = array<i32>} : memref<8x128xf32, #tpu.memory_space<vmem>>, vector<8x128xf32>,
    return
  }
  func.func @transform_0(%arg0: i32) -> (i32, i32) {
    %c0_i32 = arith.constant 0 : i32
    %c0_i32_0 = arith.constant 0 : i32
    return %arg0, %c0_i32 : i32, i32
  }
  func.func @transform_1(%arg0: i32) -> (i32, i32) {
    %c0_i32 = arith.constant 0 : i32
    %c0_i32_0 = arith.constant 0 : i32
    %c0_i32_1 = arith.constant 0 : i32
    return %c0_i32, %c0_i32_0 : i32, i32
  }
  func.func @transform_2(%arg0: i32) -> (i32, i32) {
    %c0_i32 = arith.constant 0 : i32
    %c0_i32_0 = arith.constant 0 : i32
    %c0_i32_1 = arith.constant 0 : i32
    return %c0_i32, %c0_i32_0 : i32, i32
  }
  func.func @transform_3(%arg0: i32) -> (i32, i32) {
    %c0_i32 = arith.constant 0 : i32
    %c0_i32_0 = arith.constant 0 : i32
    %c0_i32_1 = arith.constant 0 : i32
    return %c0_i32, %c0_i32_0 : i32, i32
  }
  func.func @transform_4(%arg0: i32) -> (i32, i32) {
    %c0_i32 = arith.constant 0 : i32
    %c0_i32_0 = arith.constant 0 : i32
    %c0_i32_1 = arith.constant 0 : i32
    return %c0_i32, %c0_i32_0 : i32, i32
  }
  func.func @transform_5(%arg0: i32) -> (i32, i32) {
    %c0_i32 = arith.constant 0 : i32
    %c0_i32_0 = arith.constant 0 : i32
    %c0_i32_1 = arith.constant 0 : i32
    return %c0_i32, %c0_i32_0 : i32, i32
  }
  func.func @transform_6(%arg0: i32) -> (i32, i32) {
    %c0_i32 = arith.constant 0 : i32
    %c0_i32_0 = arith.constant 0 : i32
    %c0_i32_1 = arith.constant 0 : i32
    return %c0_i32, %c0_i32_0 : i32, i32
  }
  func.func @transform_7(%arg0: i32) -> (i32, i32) {
    %c0_i32 = arith.constant 0 : i32
    %c0_i32_0 = arith.constant 0 : i32
    return %arg0, %c0_i32 : i32, i32
  }
}

</mosaic_0001>

<bundles_post_ra>
// kernel: _lambda_.1
= control target key start
LH: loop header
LB: loop body
LE: loop exit
PB: predicated region body
PF: predicated region fallthrough
CT: control target
= control target key end

     0   :  { %12 = vsyncpa [#allocation3], 0  ;;  %s582_s0 = inlined_call_operand.vmem [shape: f32[8,4], index: 0, kind: input, shape index: {}]   ;;  %s583_s1 = inlined_call_operand.vmem [shape: f32[4,128], index: 1, kind: input, shape index: {}]   ;;  %s584_s2 = inlined_call_operand.vmem [shape: f32[1,128], index: 2, kind: input, shape index: {}, may-alias: {2,4,6}]   ;;  %s585_s3 = inlined_call_operand.hbm [shape: bf16[128,128], index: 3, kind: input, shape index: {}]   ;;  %s586_s4 = inlined_call_operand.vmem [shape: f32[1,128], index: 4, kind: input, shape index: {}, may-alias: {2,4,6}]   ;;  %s587_s5 = inlined_call_operand.hbm [shape: bf16[128,128], index: 5, kind: input, shape index: {}]   ;;  %s588_s6 = inlined_call_operand.vmem [shape: f32[1,128], index: 6, kind: input, shape index: {}, may-alias: {2,4,6}]   ;;  %s589_s7 = inlined_call_operand.vmem [shape: f32[8,128], index: 7, kind: output, shape index: {}]  }
   0x1   :  { %13 = vsyncpa [#allocation5], 0  ;;  %s490_s24 = smov [#allocation2]  }
   0x2   :  { %s25_s25 = sshll.u32 %s490_s24, 4  ;;  %s26_s25 = int_to_ptr.vmem [resolvable:$true] %s25_s25 }
   0x3   :  { %s454_s26 = scalar_lea.vmem %s26_s25, 1024  ;;  %p459_p1 = scmp.lt.s32.totalorder %s26_s25, %s26_s25 }
   0x4   :  { %p455_p0 = scmp.ne.s32.totalorder %s26_s25, %s454_s26  ;;  %p460_p2 = scmp.lt.s32.totalorder %s454_s26, %s454_s26 }
   0x6   :  { %p461_p3 = por %p460_p2, %p459_p1 }
   0x8   :  { %p462_p4 = pnand %p461_p3, %p455_p0 }
   0xa   :  { %465 = shalt.err (!%p462_p4)
}
   0xb   :  { %s491_s27 = smov 64   ;;  %s492_s28 = smov 4  }
   0xc   :  { %31 = dma.hbm_to_vmem [thread:$0]  %s585_s3, 1024, %s26_s25, [#allocation3], %s491_s27, %s491_s27, %s492_s28  }
   0xd   :  { %s493_s8 = smov [#allocation4]  }
   0xe   :  { %s39_s9 = sshll.u32 %s493_s8, 4  ;;  %s40_s9 = int_to_ptr.vmem [resolvable:$true] %s39_s9 }
   0xf   :  { %s474_s10 = scalar_lea.vmem %s40_s9, 1024  ;;  %p479_p6 = scmp.lt.s32.totalorder %s40_s9, %s40_s9 }
  0x10   :  { %p475_p5 = scmp.ne.s32.totalorder %s40_s9, %s474_s10  ;;  %p480_p7 = scmp.lt.s32.totalorder %s474_s10, %s474_s10 }
  0x12   :  { %p481_p8 = por %p480_p7, %p479_p6 }
  0x14   :  { %p482_p9 = pnand %p481_p8, %p475_p5 }
  0x16   :  { %485 = shalt.err (!%p482_p9)
}
  0x17   :  { %45 = dma.hbm_to_vmem [thread:$0]  %s587_s5, 1024, %s40_s9, [#allocation5], %s491_s27, %s491_s27, %s492_s28  }
  0x18   :  { %486 = dma.done.wait [#allocation3], 1024  }
  0x19   :  { %487 = vsyncadd [#allocation3], 4294966272 }
  0x1a   :  { %488 = dma.done.wait [#allocation5], 1024  }
  0x1b   :  { %489 = vsyncadd [#allocation5], 4294966272  ;;  %v494_v0 = vmov 0   ;;  %v495_v1 = vmov 2   ;;  %v496_v2 = vmov 0.0   ;;  %v55_v3 = vld [vmem:[%s582_s0] sm:$0xff]  ;;  %v62_v20 = vlaneseq }
  0x1c   :  { %425 = vset.pattern.permute.xlu0 %v494_v0  ;;  %427 = vset.pattern.permute.xlu1 %v495_v1  ;;  %v430_v4 = vld [vmem:[#allocation2 + $0x38] sm:$0xff]   ;;  %v431_v5 = vld [vmem:[#allocation2 + $0x30] sm:$0xff]   ;;  %v497_v6 = vmov 1   ;;  %v498_v7 = vmov 3   ;;  %v432_v8 = vld [vmem:[#allocation2 + $0x28] sm:$0xff]   ;;  %vm499_vm0 = vmmov 0  }
  0x1d   :  { %375 = vmatprep.subr.bf16.mxu0 %v496_v2  ;;  %395 = vmatprep.subr.bf16.mxu1 %v496_v2  ;;  %v433_v9 = vld [vmem:[#allocation2 + $0x20] sm:$0xff]   ;;  %v434_v10 = vld [vmem:[#allocation2 + $0x18] sm:$0xff]   ;;  %v439_v12 = vld [vmem:[#allocation4 + $0x30] sm:$0xff]   ;;  %v63_v21 = vshrl.u32 %v62_v20, 7 }
  0x1e   :  { %59 = vperm.xlu0 %425, %v55_v3   ;;  %78 = vperm.xlu1 %427, %v55_v3   ;;  %v438_v11 = vld [vmem:[#allocation4 + $0x38] sm:$0xff]   ;;  %v435_v13 = vld [vmem:[#allocation2 + $0x10] sm:$0xff]   ;;  %v440_v14 = vld [vmem:[#allocation4 + $0x28] sm:$0xff]  }
  0x1f   :  { %376 = vmatpush3.bf16.msra.mxu0 %v430_v4  ;;  %391 = vmatprep.mubr.msk.bf16.mxu0 %vm499_vm0, %v496_v2  ;;  %v436_v15 = vld [vmem:[#allocation2 + $0x8] sm:$0xff]   ;;  %v441_v16 = vld [vmem:[#allocation4 + $0x20] sm:$0xff]   ;;  %v442_v18 = vld [vmem:[#allocation4 + $0x18] sm:$0xff]   ;;  %v64_v22 = vsub.s32 0, %v63_v21  ;;  %v73_v23 = vsub.s32 1, %v63_v21  ;;  %v83_v26 = vsub.s32 2, %v63_v21 }
  0x20   :  { %377 = vmatprep.subr.bf16.mxu0 %v496_v2  ;;  %411 = vmatprep.mubr.msk.bf16.mxu1 %vm499_vm0, %v496_v2  ;;  %v437_v17 = vld [vmem:[#allocation2] sm:$0xff]   ;;  %v443_v19 = vld [vmem:[#allocation4 + $0x10] sm:$0xff]   ;;  %v93_v28 = vsub.s32 3, %v63_v21  ;;  %v444_v46 = vld [vmem:[#allocation4 + $0x8] sm:$0xff]  }
  0x21   :  { %396 = vmatpush3.bf16.msra.mxu1 %v438_v11  ;;  %v56_v24 = vld [vmem:[%s583_s1] sm:$0xf] }
  0x22   :  { %426 = vset.pattern.permute.xlu0 %v497_v6  ;;  %428 = vset.pattern.permute.xlu1 %v498_v7  ;;  %v65_v29 = vrot.slane %v56_v24, %v64_v22  ;;  %v74_v30 = vrot.slane %v56_v24, %v73_v23  ;;  %v84_v31 = vrot.slane %v56_v24, %v83_v26  ;;  %v338_v41 = vld [vmem:[%s584_s2] ss:$0 sm:$0xff] }
  0x23   :  { %68 = vperm.xlu0 %426, %v55_v3   ;;  %88 = vperm.xlu1 %428, %v55_v3   ;;  %v94_v32 = vrot.slane %v56_v24, %v93_v28  ;;  %v445_v47 = vld [vmem:[#allocation4] sm:$0xff]  }
  0x24   :  { %378 = vmatpush3.bf16.msra.mxu0 %v431_v5  ;;  %397 = vmatprep.subr.bf16.mxu1 %v496_v2  ;;  %v339_v48 = vld [vmem:[%s586_s4] ss:$0 sm:$0xff] }
  0x25   :  { %379 = vmatprep.subr.bf16.mxu0 %v496_v2  ;;  %398 = vmatpush3.bf16.msra.mxu1 %v439_v12  ;;  %v348_v56 = vld [vmem:[%s588_s6] ss:$0 sm:$0xff] }
  0x26   :  { %399 = vmatprep.subr.bf16.mxu1 %v496_v2 }
  0x27   :  { %429 = vset.pattern.permute.xlu0 %v498_v7 }
  0x28   :  { %380 = vmatpush3.bf16.msra.mxu0 %v432_v8 }
  0x29   :  { %381 = vmatprep.subr.bf16.mxu0 %v496_v2  ;;  %400 = vmatpush3.bf16.msra.mxu1 %v440_v14 }
  0x2a   :  { %401 = vmatprep.subr.bf16.mxu1 %v496_v2 }
  0x2c   :  { %382 = vmatpush3.bf16.msra.mxu0 %v433_v9 }
  0x2d   :  { %383 = vmatprep.subr.bf16.mxu0 %v496_v2  ;;  %402 = vmatpush3.bf16.msra.mxu1 %v441_v16 }
  0x2e   :  { %403 = vmatprep.subr.bf16.mxu1 %v496_v2 }
  0x30   :  { %384 = vmatpush3.bf16.msra.mxu0 %v434_v10 }
  0x31   :  { %385 = vmatprep.subr.bf16.mxu0 %v496_v2  ;;  %404 = vmatpush3.bf16.msra.mxu1 %v442_v18 }
  0x32   :  { %405 = vmatprep.subr.bf16.mxu1 %v496_v2 }
  0x34   :  { %386 = vmatpush3.bf16.msra.mxu0 %v435_v13 }
  0x35   :  { %387 = vmatprep.subr.bf16.mxu0 %v496_v2  ;;  %406 = vmatpush3.bf16.msra.mxu1 %v443_v19 }
  0x36   :  { %407 = vmatprep.subr.bf16.mxu1 %v496_v2 }
  0x38   :  { %388 = vmatpush3.bf16.msra.mxu0 %v436_v15 }
  0x39   :  { %389 = vmatprep.subr.bf16.mxu0 %v496_v2  ;;  %408 = vmatpush3.bf16.msra.mxu1 %v444_v46 }
  0x3a   :  { %409 = vmatprep.subr.bf16.mxu1 %v496_v2 }
  0x3c   :  { %390 = vmatpush3.bf16.msra.mxu0 %v437_v17 }
  0x3d   :  { %410 = vmatpush3.bf16.msra.mxu1 %v445_v47 }
  0x99   :  { %v60_v25 = vpop.permute.xlu0 %59  ;;  %v79_v27 = vpop.permute.xlu1 %78 }
  0x9a   :  { %v66_v35 = vmul.f32 %v65_v29, %v60_v25  ;;  %v85_v37 = vmul.f32 %v84_v31, %v79_v27 }
  0x9e   :  { %v69_v33 = vpop.permute.xlu0 %68  ;;  %v89_v34 = vpop.permute.xlu1 %88 }
  0x9f   :  { %v75_v36 = vmul.f32 %v74_v30, %v69_v33  ;;  %v95_v39 = vmul.f32 %v94_v32, %v89_v34 }
  0xa1   :  { %v76_v38 = vadd.f32 %v75_v36, %v66_v35 }
  0xa3   :  { %v86_v40 = vadd.f32 %v85_v37, %v76_v38 }
  0xa5   :  { %v96_v42 = vadd.f32 %v95_v39, %v86_v40 }
  0xa7   :  { %v104_v43 = vadd.f32 %v338_v41, %v96_v42 }
  0xa9   :  { %v105_v44 = vmax.f32 %v104_v43, 0.0 }
  0xab   :  { %v106_v45 = vpack.c.bf16 %v105_v44, %v105_v44 }
  0xad   :  { %392 = vmatmul.mubr.bf16.vlgmr.msra.gmra.mxu0 %v106_v45 }
 0x16d   :  { %v212_v49 = vpop.f32.mrf.mxu0 }
 0x16e   :  { %v213_v50 = vadd.f32 %v339_v48, %v212_v49 }
 0x16f   :  { %v393_v51 = vpop.f32.mrf.mxu0 }
 0x170   :  { %v218_v52 = vmax.f32 %v213_v50, 0.0 }
 0x171   :  { %v215_v53 = vpop.f32.mrf.mxu0 }
 0x172   :  { %v219_v54 = vpack.c.bf16 %v218_v52, %v218_v52 }
 0x173   :  { %v394_v55 = vpop.f32.mrf.mxu0 }
 0x174   :  { %412 = vmatmul.mubr.bf16.vlgmr.msra.gmra.mxu1 %v219_v54 }
 0x234   :  { %v325_v57 = vpop.f32.mrf.mxu1 }
 0x235   :  { %v326_v58 = vadd.f32 %v348_v56, %v325_v57 }
 0x236   :  { %v413_v59 = vpop.f32.mrf.mxu1 }
 0x237   :  { %331 = vst [vmem:[%s589_s7] sm:$0xff] %v326_v58 }
 0x238   :  { %v328_v60 = vpop.f32.mrf.mxu1 }
 0x23a   :  { %v414_v61 = vpop.f32.mrf.mxu1 }
 0x23b   :  { %336 = vsyncpa [#allocation3], 1 }
 0x23c   :  { %337 = vsyncpa [#allocation5], 1 }

</bundles_post_ra>
